<compile_context>
chip_gen: v7x
topology: tpu7x:2x2x1
jax: 0.10.0
libtpu: 0.0.40
codegen_flags: <defaults>
</compile_context>

<pallas_src>
from functools import partial

import jax
import jax.numpy as jnp
from jax import lax
from jax.experimental import pallas as pl
from jax.experimental.pallas import tpu as pltpu

K = 5        # config.kernel_size
P = 2        # config.padding
S = 2        # config.stride
BN_EPS = 1e-5
VMEM_LIMIT_BYTES = 32 * 1024 * 1024      # explicit, safe on v5e/v6e/v7x


# ---------------------------------------------------------------------------
# Pass 1: conv matmul (MXU) + single-pass sum / sum-of-squares accumulation
# ---------------------------------------------------------------------------
def _conv_stats_kernel(p_ref, w_ref, conv_ref, stats_ref):
    # [tile_m, Kp] bf16 @ [Kp, Np] bf16 -> f32 (MXU, full 128-wide N).
    conv = jnp.dot(p_ref[...], w_ref[...], preferred_element_type=jnp.float32)
    conv_ref[...] = conv.astype(conv_ref.dtype)

    # Single-pass batch statistics (per-tile partial sums, f32).
    s = jnp.sum(conv, axis=0, keepdims=True)             # [1, Np]
    sq = jnp.sum(conv * conv, axis=0, keepdims=True)     # [1, Np]

    # stats block is resident across the M ("arbitrary") axis -> accumulator.
    @pl.when(pl.program_id(0) == 0)
    def _():
        stats_ref[...] = jnp.zeros_like(stats_ref)

    stats_ref[0:1, :] += s
    stats_ref[1:2, :] += sq


# ---------------------------------------------------------------------------
# Pass 2: BatchNorm (batch stats) normalize + ReLU, per M-tile (parallel)
# ---------------------------------------------------------------------------
def _bn_relu_kernel(conv_ref, stats_ref, gamma_ref, beta_ref, out_ref, *, inv_count):
    conv = conv_ref[...].astype(jnp.float32)
    mean = stats_ref[0:1, :] * inv_count
    var = jnp.maximum(stats_ref[1:2, :] * inv_count - mean * mean, 0.0)
    scale = gamma_ref[...] * lax.rsqrt(var + BN_EPS)
    shift = beta_ref[...] - mean * scale
    out_ref[...] = jnp.maximum(conv * scale + shift, 0.0).astype(out_ref.dtype)


# ---------------------------------------------------------------------------
# Wrapper plumbing
# ---------------------------------------------------------------------------
def _round_up(x, m):
    return (x + m - 1) // m * m


def _im2col(x_nchw):
    """Layout plumbing: NCHW (bf16) -> [B*Ho*Wo, Cin*K*K] patch matrix (0 FLOPs)."""
    B, C, H, W = x_nchw.shape
    Ho = (H + 2 * P - K) // S + 1
    Wo = (W + 2 * P - K) // S + 1
    xp = jnp.pad(x_nchw, ((0, 0), (0, 0), (P, P), (P, P)))
    taps = []
    for kh in range(K):
        for kw in range(K):
            taps.append(xp[:, :, kh:kh + S * Ho:S, kw:kw + S * Wo:S])  # [B, C, Ho, Wo]
    pt = jnp.stack(taps, axis=0).reshape(K, K, B, C, Ho, Wo)
    pt = pt.transpose(2, 4, 5, 3, 0, 1)                    # [B, Ho, Wo, C, K, K]
    return pt.reshape(B * Ho * Wo, C * K * K), Ho, Wo


def _choose_tile_m(M, kp, np_, conv_itemsize):
    """Largest M-tile (<=512, mult of 16) whose double-buffered set fits v7x VMEM."""
    budget = 12 * 1024 * 1024          # single-buffered target; ~2x with double buffering
    tile = 512
    while tile > 16:
        per_step = tile * kp * 2 + tile * np_ * conv_itemsize + tile * np_ * 4
        fixed = kp * np_ * 2 + 8 * np_ * 4
        if per_step + fixed <= budget:
            break
        tile //= 2
    tile = min(tile, _round_up(M, 16))
    return max(16, tile)


@partial(jax.jit, static_argnames=("out", "t", "tile_m"))
def encoder_block_forward(x_nchw, params, out=False, t=False, tile_m=None):
    """Mirrors EncoderBlock.forward (t is unused in the reference body)."""
    del t
    B, C_in, H, W = x_nchw.shape
    w = params["w"]                                        # [Cin*K*K, Cout] bf16
    C_out = w.shape[-1]

    # bf16 BEFORE im2col: the 25x byte blowup happens at half width.
    patches, Ho, Wo = _im2col(x_nchw.astype(jnp.bfloat16))
    M = B * Ho * Wo
    CK2 = C_in * K * K

    Kp = _round_up(CK2, 128)                               # contraction padded to 128
    Np = _round_up(C_out, 128)                             # lane-dense output width

    conv_dtype = jnp.float32 if out else jnp.bfloat16      # intermediate-only when out=False
    if tile_m is None:
        tile_m = _choose_tile_m(M, Kp, Np, jnp.dtype(conv_dtype).itemsize)
    Mp = _round_up(M, tile_m)
    n_tiles = Mp // tile_m

    # Zero-padding: rows pad contributes 0 to sum/sumsq (denominator is the true M);
    # channel pad (gamma=1, beta=0) stays finite and is sliced off below.
    patches = jnp.pad(patches, ((0, Mp - M), (0, Kp - CK2)))
    w_p = jnp.pad(w.astype(jnp.bfloat16), ((0, Kp - CK2), (0, Np - C_out)))
    gamma_p = jnp.pad(params["gamma"].reshape(1, -1).astype(jnp.float32),
                      ((0, 0), (0, Np - C_out)), constant_values=1.0)
    beta_p = jnp.pad(params["beta"].reshape(1, -1).astype(jnp.float32),
                     ((0, 0), (0, Np - C_out)))

    # -------- pass 1: conv + stats (M axis is the stats reduction -> arbitrary) ------
    conv2d, stats = pl.pallas_call(
        _conv_stats_kernel,
        grid=(n_tiles,),
        in_specs=[pl.BlockSpec((tile_m, Kp), lambda i: (i, 0)),
                  pl.BlockSpec((Kp, Np), lambda i: (0, 0))],
        out_specs=(pl.BlockSpec((tile_m, Np), lambda i: (i, 0)),
                   pl.BlockSpec((8, Np), lambda i: (0, 0))),
        out_shape=(jax.ShapeDtypeStruct((Mp, Np), conv_dtype),
                   jax.ShapeDtypeStruct((8, Np), jnp.float32)),
        compiler_params=pltpu.CompilerParams(
            dimension_semantics=("arbitrary",),
            vmem_limit_bytes=VMEM_LIMIT_BYTES),
    )(patches, w_p)

    # -------- pass 2: BN normalize + ReLU (independent tiles -> parallel) ------------
    relu2d = pl.pallas_call(
        partial(_bn_relu_kernel, inv_count=1.0 / M),
        grid=(n_tiles,),
        in_specs=[pl.BlockSpec((tile_m, Np), lambda i: (i, 0)),
                  pl.BlockSpec((8, Np), lambda i: (0, 0)),
                  pl.BlockSpec((1, Np), lambda i: (0, 0)),
                  pl.BlockSpec((1, Np), lambda i: (0, 0))],
        out_specs=pl.BlockSpec((tile_m, Np), lambda i: (i, 0)),
        out_shape=jax.ShapeDtypeStruct((Mp, Np), jnp.float32),
        compiler_params=pltpu.CompilerParams(
            dimension_semantics=("parallel",),
            vmem_limit_bytes=VMEM_LIMIT_BYTES),
    )(conv2d, stats, gamma_p, beta_p)

    def to_nchw(a2d):
        return a2d[:M, :C_out].reshape(B, Ho, Wo, C_out).transpose(0, 3, 1, 2)

    if out:
        return to_nchw(relu2d), to_nchw(conv2d.astype(jnp.float32))
    return to_nchw(relu2d)


# ---------------------------------------------------------------------------
# Parameters + pure-JAX reference (for correctness check)
# ---------------------------------------------------------------------------
def init_params(key, c_in, c_out):
    w = 0.02 * jax.random.normal(key, (c_in, K, K, c_out), jnp.float32)
    return dict(
        w=w.reshape(c_in * K * K, c_out).astype(jnp.bfloat16),  # [Cin*K*K, Cout]
        gamma=jnp.ones((1, c_out), jnp.float32),                 # BN weight
        beta=jnp.zeros((1, c_out), jnp.float32),                 # BN bias
    )


def _ref_forward(x_nchw, params):
    c_in = x_nchw.shape[1]
    c_out = params["w"].shape[-1]
    xb = x_nchw.astype(jnp.bfloat16).astype(jnp.float32)
    w = params["w"].astype(jnp.float32).reshape(c_in, K, K, c_out).transpose(3, 0, 1, 2)
    conv = jax.lax.conv_general_dilated(
        xb, w, window_strides=(S, S), padding=((P, P), (P, P)),
        dimension_numbers=("NCHW", "OIHW", "NCHW"),
        precision=jax.lax.Precision.HIGHEST)
    mean = conv.mean(axis=(0, 2, 3), keepdims=True)
    var = jnp.square(conv - mean).mean(axis=(0, 2, 3), keepdims=True)
    y = (conv - mean) * jax.lax.rsqrt(var + BN_EPS)
    y = y * params["gamma"].reshape(1, -1, 1, 1) + params["beta"].reshape(1, -1, 1, 1)
    return jnp.maximum(y, 0.0), conv


# ---------------------------------------------------------------------------
if __name__ == "__main__":
    B, C_IN, C_OUT, H, W = 2, 4, 32, 16, 16
    key = jax.random.PRNGKey(0)
    k_param, k_x = jax.random.split(key)
    params = init_params(k_param, C_IN, C_OUT)
    x = jax.random.normal(k_x, (B, C_IN, H, W), jnp.float32)

    ten, ten_out = encoder_block_forward(x, params, out=True)        # out=True branch
    ten_only = encoder_block_forward(x, params, out=False)           # default branch
    ten_mt, ten_out_mt = encoder_block_forward(x, params, out=True, tile_m=64)  # multi-tile path
    jax.block_until_ready((ten, ten_out, ten_only, ten_mt, ten_out_mt))

    Ho = (H + 2 * P - K) // S + 1
    Wo = (W + 2 * P - K) // S + 1
    assert ten.shape == (B, C_OUT, Ho, Wo)
    assert ten_out.shape == (B, C_OUT, Ho, Wo)
    assert ten_only.shape == (B, C_OUT, Ho, Wo)
    assert bool(jnp.all(ten >= 0.0))
    assert bool(jnp.all(ten_only >= 0.0))

    ref_relu, ref_conv = _ref_forward(x, params)
    assert bool(jnp.allclose(ten_out, ref_conv, atol=5e-2, rtol=5e-2))
    assert bool(jnp.allclose(ten, ref_relu, atol=5e-2, rtol=5e-2))
    assert bool(jnp.allclose(ten_only, ref_relu, atol=5e-2, rtol=5e-2))
    # Cross-tile stats accumulation path must agree with the single-tile path.
    assert bool(jnp.allclose(ten_mt, ten, atol=1e-3, rtol=1e-3))
    assert bool(jnp.allclose(ten_out_mt, ten_out, atol=1e-3, rtol=1e-3))

    print("KERNEL_OK")
</pallas_src>

<mosaic_0001>
module attributes {stable_mosaic.version = 11 : i64} {
  func.func @_conv_stats_kernel(%arg0: i32, %arg1: memref<128x128xbf16, #tpu.memory_space<vmem>>, %arg2: memref<128x128xbf16, #tpu.memory_space<vmem>>, %arg3: memref<128x128xf32, #tpu.memory_space<vmem>>, %arg4: memref<8x128xf32, #tpu.memory_space<vmem>>) attributes {dimension_semantics = [#tpu.dimension_semantics<arbitrary>], iteration_bounds = array<i64: 1>, scalar_prefetch = 0 : i64, scratch_operands = 0 : i64, tpu.core_type = #tpu.core_type<tc>, window_params = [{transform_indices = @transform_0, window_bounds = array<i64: 128, 128>}, {pipeline_mode = #tpu.pipeline_mode<synchronous>, transform_indices = @transform_1, window_bounds = array<i64: 128, 128>}, {transform_indices = @transform_2, window_bounds = array<i64: 128, 128>}, {pipeline_mode = #tpu.pipeline_mode<synchronous>, transform_indices = @transform_3, window_bounds = array<i64: 8, 128>}]} {
    %c0 = arith.constant 0 : index
    %c0_0 = arith.constant 0 : index
    %0 = vector.load %arg1[%c0, %c0_0] : memref<128x128xbf16, #tpu.memory_space<vmem>>, vector<128x128xbf16>
    %c0_1 = arith.constant 0 : index
    %c0_2 = arith.constant 0 : index
    %1 = vector.load %arg2[%c0_1, %c0_2] : memref<128x128xbf16, #tpu.memory_space<vmem>>, vector<128x128xbf16>
    %cst = arith.constant dense<0.000000e+00> : vector<128x128xf32>
    %2 = tpu.matmul %0, %1, %cst {dimension_numbers = #tpu.dot_dimension_numbers<[1], [0], [0], [1], [0, 0, 1, 1], [], []>} : vector<128x128xbf16>, vector<128x128xbf16>, vector<128x128xf32> -> vector<128x128xf32>
    %c0_3 = arith.constant 0 : index
    %c0_4 = arith.constant 0 : index
    %3 = vector.load %arg3[%c0_3, %c0_4] : memref<128x128xf32, #tpu.memory_space<vmem>>, vector<128x128xf32>
    tpu.vector_store %arg3[%c0_3, %c0_4], %2 {strides = array<i32>} : memref<128x128xf32, #tpu.memory_space<vmem>>, vector<128x128xf32>,
    %cst_5 = arith.constant dense<0.000000e+00> : vector<128xf32>
    %4 = vector.multi_reduction <add>, %2, %cst_5 [0] : vector<128x128xf32> to vector<128xf32>
    %5 = vector.shape_cast %4 : vector<128xf32> to vector<1x128xf32>
    %6 = arith.mulf %2, %2 : vector<128x128xf32>
    %cst_6 = arith.constant dense<0.000000e+00> : vector<128xf32>
    %7 = vector.multi_reduction <add>, %6, %cst_6 [0] : vector<128x128xf32> to vector<128xf32>
    %8 = vector.shape_cast %7 : vector<128xf32> to vector<1x128xf32>
    %c0_i32 = arith.constant 0 : i32
    %9 = arith.cmpi eq, %arg0, %c0_i32 : i32
    %10 = arith.extui %9 : i1 to i32
    %c0_i32_7 = arith.constant 0 : i32
    %11 = arith.cmpi ne, %10, %c0_i32_7 : i32
    scf.if %11 {
      %cst_15 = arith.constant 0.000000e+00 : f32
      %18 = vector.broadcast %cst_15 : f32 to vector<8x128xf32>
      %c0_16 = arith.constant 0 : index
      %c0_17 = arith.constant 0 : index
      %19 = vector.load %arg4[%c0_16, %c0_17] : memref<8x128xf32, #tpu.memory_space<vmem>>, vector<8x128xf32>
      tpu.vector_store %arg4[%c0_16, %c0_17], %18 {strides = array<i32>} : memref<8x128xf32, #tpu.memory_space<vmem>>, vector<8x128xf32>,
    } else {
    }
    %c0_8 = arith.constant 0 : index
    %c0_9 = arith.constant 0 : index
    %12 = vector.load %arg4[%c0_8, %c0_9] : memref<8x128xf32, #tpu.memory_space<vmem>>, vector<1x128xf32>
    %13 = arith.addf %12, %5 : vector<1x128xf32>
    %c0_10 = arith.constant 0 : index
    %c0_11 = arith.constant 0 : index
    %14 = vector.load %arg4[%c0_10, %c0_11] : memref<8x128xf32, #tpu.memory_space<vmem>>, vector<1x128xf32>
    tpu.vector_store %arg4[%c0_10, %c0_11], %13 {strides = array<i32>} : memref<8x128xf32, #tpu.memory_space<vmem>>, vector<1x128xf32>,
    %c1 = arith.constant 1 : index
    %c0_12 = arith.constant 0 : index
    %15 = vector.load %arg4[%c1, %c0_12] : memref<8x128xf32, #tpu.memory_space<vmem>>, vector<1x128xf32>
    %16 = arith.addf %15, %8 : vector<1x128xf32>
    %c1_13 = arith.constant 1 : index
    %c0_14 = arith.constant 0 : index
    %17 = vector.load %arg4[%c1_13, %c0_14] : memref<8x128xf32, #tpu.memory_space<vmem>>, vector<1x128xf32>
    tpu.vector_store %arg4[%c1_13, %c0_14], %16 {strides = array<i32>} : memref<8x128xf32, #tpu.memory_space<vmem>>, vector<1x128xf32>,
    return
  }
  func.func @transform_0(%arg0: i32) -> (i32, i32) {
    %c0_i32 = arith.constant 0 : i32
    %c0_i32_0 = arith.constant 0 : i32
    return %arg0, %c0_i32 : i32, i32
  }
  func.func @transform_1(%arg0: i32) -> (i32, i32) {
    %c0_i32 = arith.constant 0 : i32
    %c0_i32_0 = arith.constant 0 : i32
    %c0_i32_1 = arith.constant 0 : i32
    return %c0_i32, %c0_i32_0 : i32, i32
  }
  func.func @transform_2(%arg0: i32) -> (i32, i32) {
    %c0_i32 = arith.constant 0 : i32
    %c0_i32_0 = arith.constant 0 : i32
    return %arg0, %c0_i32 : i32, i32
  }
  func.func @transform_3(%arg0: i32) -> (i32, i32) {
    %c0_i32 = arith.constant 0 : i32
    %c0_i32_0 = arith.constant 0 : i32
    %c0_i32_1 = arith.constant 0 : i32
    return %c0_i32, %c0_i32_0 : i32, i32
  }
}

module attributes {stable_mosaic.version = 11 : i64} {
  func.func @_bn_relu_kernel(%arg0: i32, %arg1: memref<128x128xf32, #tpu.memory_space<vmem>>, %arg2: memref<8x128xf32, #tpu.memory_space<vmem>>, %arg3: memref<1x128xf32, #tpu.memory_space<vmem>>, %arg4: memref<1x128xf32, #tpu.memory_space<vmem>>, %arg5: memref<128x128xf32, #tpu.memory_space<vmem>>) attributes {dimension_semantics = [#tpu.dimension_semantics<parallel>], iteration_bounds = array<i64: 1>, scalar_prefetch = 0 : i64, scratch_operands = 0 : i64, tpu.core_type = #tpu.core_type<tc>, window_params = [{transform_indices = @transform_0, window_bounds = array<i64: 128, 128>}, {pipeline_mode = #tpu.pipeline_mode<synchronous>, transform_indices = @transform_1, window_bounds = array<i64: 8, 128>}, {pipeline_mode = #tpu.pipeline_mode<synchronous>, transform_indices = @transform_2, window_bounds = array<i64: 1, 128>}, {pipeline_mode = #tpu.pipeline_mode<synchronous>, transform_indices = @transform_3, window_bounds = array<i64: 1, 128>}, {transform_indices = @transform_4, window_bounds = array<i64: 128, 128>}]} {
    %c0 = arith.constant 0 : index
    %c0_0 = arith.constant 0 : index
    %0 = vector.load %arg1[%c0, %c0_0] : memref<128x128xf32, #tpu.memory_space<vmem>>, vector<128x128xf32>
    %c0_1 = arith.constant 0 : index
    %c0_2 = arith.constant 0 : index
    %1 = vector.load %arg2[%c0_1, %c0_2] : memref<8x128xf32, #tpu.memory_space<vmem>>, vector<1x128xf32>
    %cst = arith.constant 7.812500e-03 : f32
    %2 = vector.broadcast %cst : f32 to vector<1x128xf32>
    %3 = arith.mulf %1, %2 : vector<1x128xf32>
    %c1 = arith.constant 1 : index
    %c0_3 = arith.constant 0 : index
    %4 = vector.load %arg2[%c1, %c0_3] : memref<8x128xf32, #tpu.memory_space<vmem>>, vector<1x128xf32>
    %cst_4 = arith.constant 7.812500e-03 : f32
    %5 = vector.broadcast %cst_4 : f32 to vector<1x128xf32>
    %6 = arith.mulf %4, %5 : vector<1x128xf32>
    %7 = arith.mulf %3, %3 : vector<1x128xf32>
    %8 = arith.subf %6, %7 : vector<1x128xf32>
    %cst_5 = arith.constant 0.000000e+00 : f32
    %9 = vector.broadcast %cst_5 : f32 to vector<1x128xf32>
    %10 = arith.maximumf %8, %9 : vector<1x128xf32>
    %c0_6 = arith.constant 0 : index
    %c0_7 = arith.constant 0 : index
    %11 = vector.load %arg3[%c0_6, %c0_7] : memref<1x128xf32, #tpu.memory_space<vmem>>, vector<1x128xf32>
    %cst_8 = arith.constant 9.99999974E-6 : f32
    %12 = vector.broadcast %cst_8 : f32 to vector<1x128xf32>
    %13 = arith.addf %10, %12 : vector<1x128xf32>
    %14 = math.rsqrt %13 : vector<1x128xf32>
    %15 = arith.mulf %11, %14 : vector<1x128xf32>
    %c0_9 = arith.constant 0 : index
    %c0_10 = arith.constant 0 : index
    %16 = vector.load %arg4[%c0_9, %c0_10] : memref<1x128xf32, #tpu.memory_space<vmem>>, vector<1x128xf32>
    %17 = arith.mulf %3, %15 : vector<1x128xf32>
    %18 = arith.subf %16, %17 : vector<1x128xf32>
    %19 = vector.broadcast %15 : vector<1x128xf32> to vector<128x128xf32>
    %20 = arith.mulf %0, %19 : vector<128x128xf32>
    %21 = vector.broadcast %18 : vector<1x128xf32> to vector<128x128xf32>
    %22 = arith.addf %20, %21 : vector<128x128xf32>
    %cst_11 = arith.constant 0.000000e+00 : f32
    %23 = vector.broadcast %cst_11 : f32 to vector<128x128xf32>
    %24 = arith.maximumf %22, %23 : vector<128x128xf32>
    %c0_12 = arith.constant 0 : index
    %c0_13 = arith.constant 0 : index
    %25 = vector.load %arg5[%c0_12, %c0_13] : memref<128x128xf32, #tpu.memory_space<vmem>>, vector<128x128xf32>
    tpu.vector_store %arg5[%c0_12, %c0_13], %24 {strides = array<i32>} : memref<128x128xf32, #tpu.memory_space<vmem>>, vector<128x128xf32>,
    return
  }
  func.func @transform_0(%arg0: i32) -> (i32, i32) {
    %c0_i32 = arith.constant 0 : i32
    %c0_i32_0 = arith.constant 0 : i32
    return %arg0, %c0_i32 : i32, i32
  }
  func.func @transform_1(%arg0: i32) -> (i32, i32) {
    %c0_i32 = arith.constant 0 : i32
    %c0_i32_0 = arith.constant 0 : i32
    %c0_i32_1 = arith.constant 0 : i32
    return %c0_i32, %c0_i32_0 : i32, i32
  }
  func.func @transform_2(%arg0: i32) -> (i32, i32) {
    %c0_i32 = arith.constant 0 : i32
    %c0_i32_0 = arith.constant 0 : i32
    %c0_i32_1 = arith.constant 0 : i32
    return %c0_i32, %c0_i32_0 : i32, i32
  }
  func.func @transform_3(%arg0: i32) -> (i32, i32) {
    %c0_i32 = arith.constant 0 : i32
    %c0_i32_0 = arith.constant 0 : i32
    %c0_i32_1 = arith.constant 0 : i32
    return %c0_i32, %c0_i32_0 : i32, i32
  }
  func.func @transform_4(%arg0: i32) -> (i32, i32) {
    %c0_i32 = arith.constant 0 : i32
    %c0_i32_0 = arith.constant 0 : i32
    return %arg0, %c0_i32 : i32, i32
  }
}

</mosaic_0001>

<bundles_post_ra>
// kernel: encoder_block_forward.2
= control target key start
LH: loop header
LB: loop body
LE: loop exit
PB: predicated region body
PF: predicated region fallthrough
CT: control target
= control target key end

     0   :  { %v429_v16 = vmov 0.0   ;;  %s561_s1 = inlined_call_operand.vmem [shape: bf16[128,128], index: 1, kind: input, shape index: {}]   ;;  %s562_s0 = inlined_call_operand.vmem [shape: bf16[128,128], index: 0, kind: input, shape index: {}]   ;;  %s563_s3 = inlined_call_operand.vmem [shape: f32[8,128], index: 3, kind: output, shape index: {1}]   ;;  %s564_s2 = inlined_call_operand.vmem [shape: f32[128,128], index: 2, kind: output, shape index: {0}]  }
   0x1   :  { %v413_v0 = vld [vmem:[%s561_s1] sm:$0xff]   ;;  %v414_v1 = vld [vmem:[%s561_s1 + $0x8] sm:$0xff]   ;;  %v415_v2 = vld [vmem:[%s561_s1 + $0x10] sm:$0xff]   ;;  %317 = vst [vmem:[%s563_s3] sm:$0xff] %v429_v16 }
   0x2   :  { %364 = vmatprep.subr.bf16.mxu0 %v413_v0  ;;  %396 = vmatprep.subr.bf16.mxu1 %v413_v0  ;;  %v416_v3 = vld [vmem:[%s561_s1 + $0x18] sm:$0xff]   ;;  %v421_v4 = vld [vmem:[%s562_s0] sm:$0xff]   ;;  %v418_v7 = vld [vmem:[%s561_s1 + $0x28] sm:$0xff]  }
   0x3   :  { %365 = vmatpush3.bf16.msra.mxu0 %v413_v0  ;;  %404 = vmatpush3.bf16.msra.mxu1 %v413_v0  ;;  %v417_v5 = vld [vmem:[%s561_s1 + $0x20] sm:$0xff]   ;;  %v419_v8 = vld [vmem:[%s561_s1 + $0x30] sm:$0xff]   ;;  %v420_v9 = vld [vmem:[%s561_s1 + $0x38] sm:$0xff]  }
   0x4   :  { %366 = vmatprep.subr.bf16.mxu0 %v414_v1  ;;  %397 = vmatprep.subr.bf16.mxu1 %v414_v1  ;;  %v425_v6 = vld [vmem:[%s562_s0 + $0x20] sm:$0xff]   ;;  %v422_v10 = vld [vmem:[%s562_s0 + $0x8] sm:$0xff]   ;;  %v423_v12 = vld [vmem:[%s562_s0 + $0x10] sm:$0xff]  }
   0x5   :  { %380 = vmatprep.mubr.bf16.mxu0 %v421_v4  ;;  %388 = vmatprep.mubr.bf16.mxu1 %v425_v6  ;;  %v426_v11 = vld [vmem:[%s562_s0 + $0x28] sm:$0xff]   ;;  %v427_v13 = vld [vmem:[%s562_s0 + $0x30] sm:$0xff]   ;;  %v424_v14 = vld [vmem:[%s562_s0 + $0x18] sm:$0xff]  }
   0x6   :  { %v428_v15 = vld [vmem:[%s562_s0 + $0x38] sm:$0xff]  }
   0x7   :  { %367 = vmatpush3.bf16.msra.mxu0 %v414_v1  ;;  %405 = vmatpush3.bf16.msra.mxu1 %v414_v1 }
   0x8   :  { %368 = vmatprep.subr.bf16.mxu0 %v415_v2  ;;  %398 = vmatprep.subr.bf16.mxu1 %v415_v2 }
   0xb   :  { %369 = vmatpush3.bf16.msra.mxu0 %v415_v2  ;;  %406 = vmatpush3.bf16.msra.mxu1 %v415_v2 }
   0xc   :  { %370 = vmatprep.subr.bf16.mxu0 %v416_v3  ;;  %399 = vmatprep.subr.bf16.mxu1 %v416_v3 }
   0xf   :  { %371 = vmatpush3.bf16.msra.mxu0 %v416_v3  ;;  %407 = vmatpush3.bf16.msra.mxu1 %v416_v3 }
  0x10   :  { %372 = vmatprep.subr.bf16.mxu0 %v417_v5  ;;  %400 = vmatprep.subr.bf16.mxu1 %v417_v5 }
  0x13   :  { %373 = vmatpush3.bf16.msra.mxu0 %v417_v5  ;;  %408 = vmatpush3.bf16.msra.mxu1 %v417_v5 }
  0x14   :  { %374 = vmatprep.subr.bf16.mxu0 %v418_v7  ;;  %401 = vmatprep.subr.bf16.mxu1 %v418_v7 }
  0x17   :  { %375 = vmatpush3.bf16.msra.mxu0 %v418_v7  ;;  %409 = vmatpush3.bf16.msra.mxu1 %v418_v7 }
  0x18   :  { %376 = vmatprep.subr.bf16.mxu0 %v419_v8  ;;  %402 = vmatprep.subr.bf16.mxu1 %v419_v8 }
  0x1b   :  { %377 = vmatpush3.bf16.msra.mxu0 %v419_v8  ;;  %410 = vmatpush3.bf16.msra.mxu1 %v419_v8 }
  0x1c   :  { %378 = vmatprep.subr.bf16.mxu0 %v420_v9  ;;  %403 = vmatprep.subr.bf16.mxu1 %v420_v9 }
  0x1f   :  { %379 = vmatpush3.bf16.msra.mxu0 %v420_v9  ;;  %411 = vmatpush3.bf16.msra.mxu1 %v420_v9 }
  0x22   :  { %381 = vmatmul.mubr.bf16.vlgmr.msra.gmra.mrb[0].mxu0 %v422_v10  ;;  %389 = vmatmul.mubr.bf16.vlgmr.msra.gmra.mrb[0].mxu1 %v426_v11 }
  0x23   :  { %384 = vmatprep.mubr.bf16.mxu0 %v423_v12  ;;  %392 = vmatprep.mubr.bf16.mxu1 %v427_v13 }
  0x2a   :  { %385 = vmatmul.mubr.bf16.gmra.mrb[4].mxu0 %v424_v14  ;;  %393 = vmatmul.mubr.bf16.gmra.mrb[4].mxu1 %v428_v15 }
  0xf5   :  { %v382_v17 = vpop.f32.mrb[0].mxu0  ;;  %v390_v18 = vpop.f32.mrb[0].mxu1 }
  0xf6   :  { %241 = vst [vmem:[%s564_s2 + $0x10] sm:$0xff] %v382_v17  ;;  %v176_v19 = vpop.f32.mrb[1].mxu0  ;;  %249 = vst [vmem:[%s564_s2 + $0x50] sm:$0xff] %v390_v18  ;;  %v208_v20 = vpop.f32.mrb[1].mxu1  ;;  %v278_v28 = vmul.f32 %v382_v17, %v382_v17  ;;  %v286_v60 = vmul.f32 %v390_v18, %v390_v18 }
  0xf7   :  { %239 = vst [vmem:[%s564_s2] sm:$0xff] %v176_v19  ;;  %v383_v21 = vpop.f32.mrb[2].mxu0  ;;  %247 = vst [vmem:[%s564_s2 + $0x40] sm:$0xff] %v208_v20  ;;  %v391_v22 = vpop.f32.mrb[2].mxu1  ;;  %v276_v25 = vmul.f32 %v176_v19, %v176_v19  ;;  %v284_v54 = vmul.f32 %v208_v20, %v208_v20 }
  0xf8   :  { %242 = vst [vmem:[%s564_s2 + $0x18] sm:$0xff] %v383_v21  ;;  %v179_v23 = vpop.f32.mrb[3].mxu0  ;;  %250 = vst [vmem:[%s564_s2 + $0x58] sm:$0xff] %v391_v22  ;;  %v211_v24 = vpop.f32.mrb[3].mxu1  ;;  %v279_v31 = vmul.f32 %v383_v21, %v383_v21  ;;  %v287_v63 = vmul.f32 %v391_v22, %v391_v22 }
  0xf9   :  { %240 = vst [vmem:[%s564_s2 + $0x8] sm:$0xff] %v179_v23  ;;  %v255_v26 = vadd.f32 %v179_v23, %v176_v19  ;;  %v277_v27 = vmul.f32 %v179_v23, %v179_v23  ;;  %248 = vst [vmem:[%s564_s2 + $0x48] sm:$0xff] %v211_v24  ;;  %v285_v59 = vmul.f32 %v211_v24, %v211_v24 }
  0xfb   :  { %v256_v29 = vadd.f32 %v382_v17, %v255_v26  ;;  %v292_v30 = vadd.f32 %v277_v27, %v276_v25  ;;  %v321_v27 = vld [vmem:[%s563_s3 + $0x1] sm:$0x1] }
  0xfd   :  { %v293_v32 = vadd.f32 %v292_v30, %v278_v28  ;;  %v386_v33 = vpop.f32.mrb[4].mxu0  ;;  %v257_v34 = vadd.f32 %v383_v21, %v256_v29  ;;  %v394_v35 = vpop.f32.mrb[4].mxu1 }
  0xfe   :  { %245 = vst [vmem:[%s564_s2 + $0x30] sm:$0xff] %v386_v33  ;;  %v192_v36 = vpop.f32.mrb[5].mxu0  ;;  %253 = vst [vmem:[%s564_s2 + $0x70] sm:$0xff] %v394_v35  ;;  %v224_v37 = vpop.f32.mrb[5].mxu1  ;;  %v282_v48 = vmul.f32 %v386_v33, %v386_v33  ;;  %v290_v8 = vmul.f32 %v394_v35, %v394_v35 }
  0xff   :  { %243 = vst [vmem:[%s564_s2 + $0x20] sm:$0xff] %v192_v36  ;;  %v258_v38 = vadd.f32 %v257_v34, %v192_v36  ;;  %v280_v39 = vmul.f32 %v192_v36, %v192_v36  ;;  %v294_v40 = vadd.f32 %v293_v32, %v279_v31  ;;  %v387_v41 = vpop.f32.mrb[6].mxu0  ;;  %251 = vst [vmem:[%s564_s2 + $0x60] sm:$0xff] %v224_v37  ;;  %v395_v42 = vpop.f32.mrb[6].mxu1 }
 0x100   :  { %246 = vst [vmem:[%s564_s2 + $0x38] sm:$0xff] %v387_v41  ;;  %v195_v43 = vpop.f32.mrb[7].mxu0  ;;  %254 = vst [vmem:[%s564_s2 + $0x78] sm:$0xff] %v395_v42  ;;  %v227_v44 = vpop.f32.mrb[7].mxu1  ;;  %v283_v51 = vmul.f32 %v387_v41, %v387_v41  ;;  %v288_v2 = vmul.f32 %v224_v37, %v224_v37  ;;  %v291_v11 = vmul.f32 %v395_v42, %v395_v42 }
 0x101   :  { %v295_v45 = vadd.f32 %v294_v40, %v280_v39  ;;  %244 = vst [vmem:[%s564_s2 + $0x28] sm:$0xff] %v195_v43  ;;  %v259_v46 = vadd.f32 %v258_v38, %v195_v43  ;;  %v281_v47 = vmul.f32 %v195_v43, %v195_v43  ;;  %252 = vst [vmem:[%s564_s2 + $0x68] sm:$0xff] %v227_v44 }
 0x102   :  { %v289_v7 = vmul.f32 %v227_v44, %v227_v44 }
 0x103   :  { %v260_v49 = vadd.f32 %v386_v33, %v259_v46  ;;  %v296_v50 = vadd.f32 %v295_v45, %v281_v47 }
 0x105   :  { %v297_v52 = vadd.f32 %v296_v50, %v282_v48  ;;  %v261_v53 = vadd.f32 %v387_v41, %v260_v49 }
 0x107   :  { %v262_v55 = vadd.f32 %v261_v53, %v208_v20  ;;  %v298_v56 = vadd.f32 %v297_v52, %v283_v51 }
 0x109   :  { %v299_v57 = vadd.f32 %v298_v56, %v284_v54  ;;  %v263_v58 = vadd.f32 %v262_v55, %v211_v24  ;;  %v318_v24 = vld [vmem:[%s563_s3] sm:$0x1] }
 0x10b   :  { %v264_v61 = vadd.f32 %v390_v18, %v263_v58  ;;  %v300_v62 = vadd.f32 %v299_v57, %v285_v59 }
 0x10d   :  { %v301_v0 = vadd.f32 %v300_v62, %v286_v60  ;;  %v265_v1 = vadd.f32 %v391_v22, %v264_v61 }
 0x10f   :  { %v266_v3 = vadd.f32 %v265_v1, %v224_v37  ;;  %v302_v4 = vadd.f32 %v301_v0, %v287_v63 }
 0x111   :  { %v303_v5 = vadd.f32 %v302_v4, %v288_v2  ;;  %v267_v6 = vadd.f32 %v266_v3, %v227_v44 }
 0x113   :  { %v268_v9 = vadd.f32 %v394_v35, %v267_v6  ;;  %v304_v10 = vadd.f32 %v303_v5, %v289_v7 }
 0x115   :  { %v269_v12 = vadd.f32 %v395_v42, %v268_v9  ;;  %v305_v13 = vadd.f32 %v304_v10, %v290_v8 }
 0x117   :  { %v270_v14 = vrot.slane %v269_v12, 4  ;;  %v306_v15 = vadd.f32 %v305_v13, %v291_v11 }
 0x119   :  { %v271_v16 = vadd.f32 %v270_v14, %v269_v12  ;;  %v307_v17 = vrot.slane %v306_v15, 4 }
 0x11b   :  { %v272_v18 = vrot.slane %v271_v16, 2  ;;  %v308_v19 = vadd.f32 %v307_v17, %v306_v15 }
 0x11d   :  { %v273_v20 = vadd.f32 %v272_v18, %v271_v16  ;;  %v309_v21 = vrot.slane %v308_v19, 2 }
 0x11f   :  { %v274_v22 = vrot.slane %v273_v20, 1  ;;  %v310_v23 = vadd.f32 %v309_v21, %v308_v19 }
 0x121   :  { %v275_v25 = vadd.f32 %v274_v22, %v273_v20  ;;  %v311_v26 = vrot.slane %v310_v23, 1 }
 0x123   :  { %v312_v28 = vadd.f32 %v311_v26, %v310_v23  ;;  %v319_v29 = vadd.f32 %v318_v24, %v275_v25 }
 0x125   :  { %320 = vst [vmem:[%s563_s3] sm:$0x1] %v319_v29  ;;  %v322_v30 = vadd.f32 %v321_v27, %v312_v28 }
 0x127   :  { %323 = vst [vmem:[%s563_s3 + $0x1] sm:$0x1] %v322_v30 }

// kernel: encoder_block_forward.3
= control target key start
LH: loop header
LB: loop body
LE: loop exit
PB: predicated region body
PF: predicated region fallthrough
CT: control target
= control target key end

     0   :  { %s269_s0 = inlined_call_operand.vmem [shape: f32[128,128], index: 0, kind: input, shape index: {}]   ;;  %s270_s1 = inlined_call_operand.vmem [shape: f32[8,128], index: 1, kind: input, shape index: {}]   ;;  %s271_s2 = inlined_call_operand.vmem [shape: f32[1,128], index: 2, kind: input, shape index: {}]   ;;  %s272_s3 = inlined_call_operand.vmem [shape: f32[1,128], index: 3, kind: input, shape index: {}]   ;;  %s273_s4 = inlined_call_operand.hbm [shape: f32[128,128], index: 4, kind: output, shape index: {}]  }
   0x1   :  { %v34_v0 = vld [vmem:[%s270_s1] sm:$0x1]  ;;  %v36_v1 = vld [vmem:[%s270_s1 + $0x1] sm:$0x1] }
   0x2   :  { %v35_v2 = vmul.f32 0.0078125, %v34_v0  ;;  %v37_v3 = vmul.f32 0.0078125, %v36_v1 }
   0x4   :  { %v38_v4 = vmul.f32 %v35_v2, %v35_v2 }
   0x6   :  { %v39_v5 = vsub.f32 %v37_v3, %v38_v4 }
   0x8   :  { %v40_v6 = vmax.f32 %v39_v5, 0.0 }
   0x9   :  { %9 = vsyncpa [#allocation3], 0  ;;  %v49_v8 = vlaneseq  ;;  %v41_v10 = vld [vmem:[%s271_s2] sm:$0x1]  ;;  %v19_v16 = vld [vmem:[%s269_s0 + $0x8] sm:$0xff] }
   0xa   :  { %v42_v7 = vadd.f32 1e-05, %v40_v6  ;;  %v18_v13 = vld [vmem:[%s269_s0] sm:$0xff]  ;;  %v20_v17 = vld [vmem:[%s269_s0 + $0x10] sm:$0xff]  ;;  %v21_v18 = vld [vmem:[%s269_s0 + $0x18] sm:$0xff] }
   0xb   :  { %v50_v9 = vshrl.u32 %v49_v8, 7  ;;  %v45_v15 = vld [vmem:[%s272_s3] sm:$0x1]  ;;  %v23_v22 = vld [vmem:[%s269_s0 + $0x28] sm:$0xff]  ;;  %v24_v23 = vld [vmem:[%s269_s0 + $0x30] sm:$0xff] }
   0xc   :  { %143 = vrsqrt.f32 %v42_v7  ;;  %v22_v19 = vld [vmem:[%s269_s0 + $0x20] sm:$0xff]  ;;  %v25_v24 = vld [vmem:[%s269_s0 + $0x38] sm:$0xff]  ;;  %v27_v26 = vld [vmem:[%s269_s0 + $0x48] sm:$0xff] }
   0xd   :  { %v51_v11 = vsub.s32 0, %v50_v9  ;;  %v26_v25 = vld [vmem:[%s269_s0 + $0x40] sm:$0xff]  ;;  %v28_v27 = vld [vmem:[%s269_s0 + $0x50] sm:$0xff]  ;;  %v29_v32 = vld [vmem:[%s269_s0 + $0x58] sm:$0xff] }
   0xe   :  { %v30_v33 = vld [vmem:[%s269_s0 + $0x60] sm:$0xff]  ;;  %v31_v34 = vld [vmem:[%s269_s0 + $0x68] sm:$0xff]  ;;  %v32_v59 = vld [vmem:[%s269_s0 + $0x70] sm:$0xff] }
   0xf   :  { %v33_v60 = vld [vmem:[%s269_s0 + $0x78] sm:$0xff]  ;;  %s169_s0 = smov [#allocation2]  }
  0x10   :  { %s129_s25 = sshll.u32 %s169_s0, 4  ;;  %s130_s25 = int_to_ptr.vmem [resolvable:$true] %s129_s25 }
  0x11   :  { %s145_s26 = scalar_lea.vmem %s130_s25, 2048  ;;  %p150_p1 = scmp.lt.s32.totalorder %s130_s25, %s130_s25 }
  0x12   :  { %p146_p0 = scmp.ne.s32.totalorder %s130_s25, %s145_s26  ;;  %p151_p2 = scmp.lt.s32.totalorder %s145_s26, %s145_s26 }
  0x14   :  { %p152_p3 = por %p151_p2, %p150_p1 }
  0x16   :  { %v144_v12 = vpop.eup %143  ;;  %p153_p4 = pnand %p152_p3, %p146_p0 }
  0x17   :  { %v44_v14 = vmul.f32 %v144_v12, %v41_v10 }
  0x19   :  { %v46_v20 = vmul.f32 %v44_v14, %v35_v2  ;;  %v52_v21 = vrot.slane %v44_v14, %v51_v11 }
  0x1b   :  { %v47_v28 = vsub.f32 %v45_v15, %v46_v20  ;;  %v54_v29 = vmul.f32 %v52_v21, %v18_v13  ;;  %v55_v30 = vmul.f32 %v52_v21, %v19_v16  ;;  %v56_v31 = vmul.f32 %v52_v21, %v20_v17 }
  0x1c   :  { %v57_v35 = vmul.f32 %v52_v21, %v21_v18  ;;  %v58_v36 = vmul.f32 %v52_v21, %v22_v19  ;;  %v59_v37 = vmul.f32 %v52_v21, %v23_v22  ;;  %v60_v38 = vmul.f32 %v52_v21, %v24_v23 }
  0x1d   :  { %v74_v39 = vrot.slane %v47_v28, %v51_v11  ;;  %v61_v40 = vmul.f32 %v52_v21, %v25_v24  ;;  %v62_v41 = vmul.f32 %v52_v21, %v26_v25  ;;  %v63_v42 = vmul.f32 %v52_v21, %v27_v26 }
  0x1e   :  { %v64_v43 = vmul.f32 %v52_v21, %v28_v27  ;;  %v65_v44 = vmul.f32 %v52_v21, %v29_v32  ;;  %v66_v45 = vmul.f32 %v52_v21, %v30_v33  ;;  %v67_v46 = vmul.f32 %v52_v21, %v31_v34 }
  0x1f   :  { %v76_v47 = vadd.f32 %v74_v39, %v54_v29  ;;  %v77_v48 = vadd.f32 %v74_v39, %v55_v30  ;;  %v78_v49 = vadd.f32 %v74_v39, %v56_v31  ;;  %v79_v50 = vadd.f32 %v74_v39, %v57_v35 }
  0x20   :  { %v80_v51 = vadd.f32 %v74_v39, %v58_v36  ;;  %v81_v52 = vadd.f32 %v74_v39, %v59_v37  ;;  %v82_v53 = vadd.f32 %v74_v39, %v60_v38  ;;  %v83_v54 = vadd.f32 %v74_v39, %v61_v40 }
  0x21   :  { %v92_v55 = vmax.f32 %v76_v47, 0.0  ;;  %v93_v56 = vmax.f32 %v77_v48, 0.0  ;;  %v94_v57 = vmax.f32 %v78_v49, 0.0  ;;  %v95_v58 = vmax.f32 %v79_v50, 0.0 }
  0x22   :  { %v96_v61 = vmax.f32 %v80_v51, 0.0  ;;  %v97_v62 = vmax.f32 %v81_v52, 0.0  ;;  %v98_v63 = vmax.f32 %v82_v53, 0.0  ;;  %v99_v0 = vmax.f32 %v83_v54, 0.0 }
  0x23   :  { %108 = vst [vmem:[#allocation2] sm:$0xff] %v92_v55  ;;  %109 = vst [vmem:[#allocation2 + $0x8] sm:$0xff] %v93_v56  ;;  %v84_v1 = vadd.f32 %v74_v39, %v62_v41  ;;  %v85_v2 = vadd.f32 %v74_v39, %v63_v42  ;;  %v86_v3 = vadd.f32 %v74_v39, %v64_v43 }
  0x24   :  { %110 = vst [vmem:[#allocation2 + $0x10] sm:$0xff] %v94_v57  ;;  %111 = vst [vmem:[#allocation2 + $0x18] sm:$0xff] %v95_v58  ;;  %v87_v4 = vadd.f32 %v74_v39, %v65_v44  ;;  %v88_v5 = vadd.f32 %v74_v39, %v66_v45  ;;  %v89_v6 = vadd.f32 %v74_v39, %v67_v46 }
  0x25   :  { %112 = vst [vmem:[#allocation2 + $0x20] sm:$0xff] %v96_v61  ;;  %113 = vst [vmem:[#allocation2 + $0x28] sm:$0xff] %v97_v62  ;;  %v68_v7 = vmul.f32 %v52_v21, %v32_v59  ;;  %v69_v8 = vmul.f32 %v52_v21, %v33_v60  ;;  %v100_v9 = vmax.f32 %v84_v1, 0.0  ;;  %v101_v10 = vmax.f32 %v85_v2, 0.0 }
  0x26   :  { %114 = vst [vmem:[#allocation2 + $0x30] sm:$0xff] %v98_v63  ;;  %115 = vst [vmem:[#allocation2 + $0x38] sm:$0xff] %v99_v0  ;;  %v102_v11 = vmax.f32 %v86_v3, 0.0  ;;  %v103_v12 = vmax.f32 %v87_v4, 0.0  ;;  %v104_v13 = vmax.f32 %v88_v5, 0.0  ;;  %v105_v14 = vmax.f32 %v89_v6, 0.0 }
  0x27   :  { %v90_v15 = vadd.f32 %v74_v39, %v68_v7  ;;  %v91_v16 = vadd.f32 %v74_v39, %v69_v8  ;;  %116 = vst [vmem:[#allocation2 + $0x40] sm:$0xff] %v100_v9  ;;  %117 = vst [vmem:[#allocation2 + $0x48] sm:$0xff] %v101_v10 }
  0x28   :  { %118 = vst [vmem:[#allocation2 + $0x50] sm:$0xff] %v102_v11  ;;  %119 = vst [vmem:[#allocation2 + $0x58] sm:$0xff] %v103_v12 }
  0x29   :  { %120 = vst [vmem:[#allocation2 + $0x60] sm:$0xff] %v104_v13  ;;  %121 = vst [vmem:[#allocation2 + $0x68] sm:$0xff] %v105_v14  ;;  %v106_v17 = vmax.f32 %v90_v15, 0.0  ;;  %v107_v18 = vmax.f32 %v91_v16, 0.0 }
  0x2b   :  { %122 = vst [vmem:[#allocation2 + $0x70] sm:$0xff] %v106_v17  ;;  %123 = vst [vmem:[#allocation2 + $0x78] sm:$0xff] %v107_v18 }
  0x2c   :  { %156 = shalt.err (!%p153_p4)
}
  0x2d   :  { %s157_s28 = scalar_lea.hbm %s273_s4, 2048 }
  0x2e   :  { %p158_p5 = scmp.ne.s32.totalorder %s273_s4, %s157_s28  ;;  %p161_p6 = scmp.lt.u32.totalorder %s157_s28, %s273_s4 }
  0x30   :  { %p163_p7 = pnand %p161_p6, %p158_p5 }
  0x32   :  { %166 = shalt.err (!%p163_p7)
}
  0x33   :  { %s170_s6 = smov 128   ;;  %s171_s7 = smov 8  }
  0x34   :  { %135 = dma.vmem_to_hbm [thread:$0]  %s130_s25, 2048, %s273_s4, [#allocation3], %s170_s6, %s170_s6, %s171_s7  }
  0x35   :  { %167 = dma.done.wait [#allocation3], 2048  }
  0x36   :  { %168 = vsyncadd [#allocation3], 4294965248 }
  0x37   :  { %139 = vsyncpa [#allocation3], 1 }

</bundles_post_ra>
